<compile_context>
chip_gen: v6e
topology: v6e:2x2x1
jax: 0.10.0
libtpu: 0.0.40
codegen_flags: <defaults>
</compile_context>

<pallas_src>
import functools

import jax
import jax.numpy as jnp
import numpy as np
from jax.experimental import pallas as pl
from jax.experimental.pallas import tpu as pltpu

# ---- static model hyper-parameters (defaults of LSTMEEG) ----
KT = 33        # cnn_temporal_kernelsize[0]  (over time)
K1 = 40        # cnn_temporal_kernels
K2 = 40        # cnn_spatial_kernels
POOL_K = 38    # cnn_poolsize[0]   (over time)
POOL_S = 17    # cnn_poolstride[0] (over time)
HID = 64       # LSTM hidden size
NCLS = 4       # dense_n_neurons
BN_EPS = 1e-5


# ----------------------------------------------------------------------------
# Fused per-sample kernel: PatchEmbedding + LSTM + Linear + LogSoftmax.
# One grid step == one batch sample.
# ----------------------------------------------------------------------------
def _lstm_eeg_kernel(xun_ref, wf_ref, shift_ref, pmat_ref, wih_ref, whh_ref,
                     bl_ref, wfc_ref, bfc_ref, o_ref, *, Spool):
    # --- embedding: fused temporal*spatial conv (one MXU matmul) + folded BN ---
    h3 = jnp.dot(xun_ref[0], wf_ref[...],
                 preferred_element_type=jnp.float32) + shift_ref[...]      # (Tp, K2)
    # ELU(alpha=1): clamp before exp so the untaken branch never overflows
    h3 = jnp.where(h3 > 0, h3, jnp.exp(jnp.minimum(h3, 0.0)) - 1.0)
    # avg-pool over time as an MXU matmul; dropout = identity at inference
    pooled = jnp.dot(pmat_ref[...], h3,
                     preferred_element_type=jnp.float32)                   # (Spool, K2)

    # --- hoisted LSTM input projection (1x1 projection pre-folded into wih) ---
    gx = jnp.dot(pooled, wih_ref[...],
                 preferred_element_type=jnp.float32) + bl_ref[...]         # (Spool, 4H)

    # --- LSTM recurrence: gate column order (i,f,o,g); h/c live in vregs ---
    whh = whh_ref[...]                                                     # (HID, 4H)
    h = jnp.zeros((1, HID), jnp.float32)
    c = jnp.zeros((1, HID), jnp.float32)
    # TODO(synk): for long sequences (Spool >> 8) switch this static unroll to
    # lax.fori_loop (small unroll) reading gx[t] from a VMEM scratch, with h/c
    # as loop carries, to avoid vreg live-range blowup.
    for t in range(Spool):
        g = gx[t:t + 1, :] + jnp.dot(h, whh, preferred_element_type=jnp.float32)
        sg = jax.nn.sigmoid(g[:, :3 * HID])      # i,f,o in one contiguous EUP pass
        gg = jnp.tanh(g[:, 3 * HID:])            # g gate
        i_g = sg[:, 0 * HID:1 * HID]
        f_g = sg[:, 1 * HID:2 * HID]
        o_g = sg[:, 2 * HID:3 * HID]
        c = f_g * c + i_g * gg
        h = o_g * jnp.tanh(c)

    # --- Linear(64 -> 4) + LogSoftmax(dim=1) ---
    logits = jnp.dot(h, wfc_ref[...],
                     preferred_element_type=jnp.float32) + bfc_ref[...]    # (1, NCLS)
    m = jnp.max(logits, axis=1, keepdims=True)
    z = logits - m
    lse = jnp.log(jnp.sum(jnp.exp(z), axis=1, keepdims=True))
    o_ref[0] = z - lse


# ----------------------------------------------------------------------------
# Wrapper: weight folding + im2col (layout plumbing), then one pallas_call.
# ----------------------------------------------------------------------------
def lstm_eeg_forward(x, params, *, use_bf16=False):
    B, T, C, _ = x.shape
    Tp = T - KT + 1
    Spool = (Tp - POOL_K) // POOL_S + 1
    KTC = KT * C

    # ---- constant-fold weights (these fold to constants under jit) ----
    wt = params["wt"][:, 0, :]                                   # (KT, K1)
    ws = params["ws"]                                            # (C, K1, K2)
    wf = jnp.einsum("ki,cio->kco", wt, ws).reshape(KTC, K2)      # fused conv weight
    beff = (params["bs"].reshape(K2)
            + jnp.einsum("i,cio->o", params["bt"].reshape(K1), ws)).reshape(1, K2)
    # BatchNorm2d (eval) folded into the conv weight / shift
    wf = wf * params["bn_scale"]                                 # (KTC, K2)
    shift = beff * params["bn_scale"] + params["bn_shift"]       # (1, K2)

    # 1x1 projection folded into the LSTM input projection (dropout = identity)
    wih = params["wp"] @ params["w_ih"]                          # (K2, 4H)
    bl = params["bp"] @ params["w_ih"] + params["b_lstm"]        # (1, 4H)
    whh = params["w_hh"]                                         # (HID, 4H)
    # permute gate columns (i,f,g,o) -> (i,f,o,g): contiguous sigmoid/tanh slabs
    perm = jnp.concatenate([jnp.arange(0, 2 * HID),
                            jnp.arange(3 * HID, 4 * HID),
                            jnp.arange(2 * HID, 3 * HID)])
    wih = wih[:, perm]
    whh = whh[:, perm]
    bl = bl[:, perm]

    # average-pool as a (Spool, Tp) matrix with 1/POOL_K window weights
    t_idx = jnp.arange(Tp)[None, :]
    p0 = jnp.arange(Spool)[:, None] * POOL_S
    pmat = jnp.where((t_idx >= p0) & (t_idx < p0 + POOL_K),
                     1.0 / POOL_K, 0.0).astype(jnp.float32)

    # im2col unfold (zero FLOPs, lane-dense last dim): xun[b,t,k*C+c] = x[b,t+k,c]
    # TODO(synk): for long sequences on low-HBM-BW parts (v5e) pass the raw
    # (1,T,C) block instead and shift-accumulate the temporal conv in-kernel to
    # avoid materializing the KT-times-inflated slab in HBM.
    x_sq = x[..., 0]                                             # (B, T, C)
    xun = jnp.concatenate([x_sq[:, k:k + Tp, :] for k in range(KT)], axis=-1)

    if use_bf16:
        # TODO(synk): bf16 conv inputs (2x MXU, half the HBM traffic); re-validate
        # against the output tolerance when enabling at production scale.
        xun = xun.astype(jnp.bfloat16)
        wf = wf.astype(jnp.bfloat16)

    out3 = pl.pallas_call(
        functools.partial(_lstm_eeg_kernel, Spool=Spool),
        out_shape=jax.ShapeDtypeStruct((B, 1, NCLS), jnp.float32),
        grid=(B,),
        in_specs=[
            pl.BlockSpec((1, Tp, KTC), lambda b: (b, 0, 0)),     # per-sample slab
            pl.BlockSpec((KTC, K2), lambda b: (0, 0)),           # weights: constant block
            pl.BlockSpec((1, K2), lambda b: (0, 0)),             # (not re-DMA'd per step)
            pl.BlockSpec((Spool, Tp), lambda b: (0, 0)),
            pl.BlockSpec((K2, 4 * HID), lambda b: (0, 0)),
            pl.BlockSpec((HID, 4 * HID), lambda b: (0, 0)),
            pl.BlockSpec((1, 4 * HID), lambda b: (0, 0)),
            pl.BlockSpec((HID, NCLS), lambda b: (0, 0)),
            pl.BlockSpec((1, NCLS), lambda b: (0, 0)),
        ],
        out_specs=pl.BlockSpec((1, 1, NCLS), lambda b: (b, 0, 0)),
        compiler_params=pltpu.CompilerParams(
            # batch axis parallel -> megacore sharding on v7x; set
            # vmem_limit_bytes explicitly when scaling Tp/B.
            dimension_semantics=("parallel",)),
    )(xun, wf, shift, pmat, wih, whh, bl, params["w_fc"], params["b_fc"])
    return out3.reshape(B, NCLS)


# ----------------------------------------------------------------------------
# Deterministic parameter init (shapes per LSTMEEG.__init__; synthetic values)
# ----------------------------------------------------------------------------
def init_params(key, C):
    keys = jax.random.split(key, 13)

    def rnd(k, shape, scale):
        return scale * jax.random.normal(k, shape, dtype=jnp.float32)

    gamma = 1.0 + 0.1 * jax.random.normal(keys[8], (K2,), dtype=jnp.float32)
    beta = 0.1 * jax.random.normal(keys[9], (K2,), dtype=jnp.float32)
    running_mean = jnp.zeros((K2,), jnp.float32)
    running_var = jnp.ones((K2,), jnp.float32)
    bn_scale = gamma / jnp.sqrt(running_var + BN_EPS)
    bn_shift = beta - running_mean * bn_scale

    return dict(
        wt=rnd(keys[0], (KT, 1, K1), 0.1),          # temporal conv weight (kt, in=1, out)
        bt=rnd(keys[1], (1, 1, K1), 0.1),
        ws=rnd(keys[2], (C, K1, K2), 0.05),         # spatial conv weight (eeg-ch, in, out)
        bs=rnd(keys[3], (1, K2), 0.1),
        bn_scale=bn_scale.reshape(1, K2),
        bn_shift=bn_shift.reshape(1, K2),
        wp=rnd(keys[4], (K2, K2), 0.1),             # 1x1 projection
        bp=rnd(keys[5], (1, K2), 0.1),
        w_ih=rnd(keys[6], (K2, 4 * HID), 0.1),      # LSTM input weights (transposed)
        w_hh=rnd(keys[7], (HID, 4 * HID), 0.1),     # LSTM recurrent weights (transposed)
        b_lstm=rnd(keys[10], (1, 4 * HID), 0.1),    # b_ih + b_hh combined
        w_fc=rnd(keys[11], (HID, NCLS), 0.1),
        b_fc=rnd(keys[12], (1, NCLS), 0.1),
    )


# ----------------------------------------------------------------------------
# Pure-JAX reference (unfolded math, original gate order) for correctness check
# ----------------------------------------------------------------------------
def reference_forward(x, params):
    B, T, C, _ = x.shape
    Tp = T - KT + 1
    Spool = (Tp - POOL_K) // POOL_S + 1
    xs = x[..., 0]                                              # (B, T, C)
    wt = params["wt"][:, 0, :]                                  # (KT, K1)
    h1 = jnp.zeros((B, Tp, C, K1)) + params["bt"].reshape(1, 1, 1, K1)
    for k in range(KT):
        h1 = h1 + xs[:, k:k + Tp, :, None] * wt[k].reshape(1, 1, 1, K1)
    h2 = jnp.einsum("btci,cio->bto", h1, params["ws"]) + params["bs"].reshape(1, 1, K2)
    h3 = h2 * params["bn_scale"].reshape(1, 1, K2) + params["bn_shift"].reshape(1, 1, K2)
    h3 = jnp.where(h3 > 0, h3, jnp.expm1(h3))
    pooled = jnp.stack([jnp.mean(h3[:, p * POOL_S:p * POOL_S + POOL_K, :], axis=1)
                        for p in range(Spool)], axis=1)
    seq = jnp.einsum("bsf,fo->bso", pooled, params["wp"]) + params["bp"].reshape(1, 1, K2)
    h = jnp.zeros((B, HID), jnp.float32)
    c = jnp.zeros((B, HID), jnp.float32)
    for t in range(Spool):
        gates = seq[:, t, :] @ params["w_ih"] + h @ params["w_hh"] + params["b_lstm"]
        i_g = jax.nn.sigmoid(gates[:, :HID])
        f_g = jax.nn.sigmoid(gates[:, HID:2 * HID])
        g_g = jnp.tanh(gates[:, 2 * HID:3 * HID])
        o_g = jax.nn.sigmoid(gates[:, 3 * HID:])
        c = f_g * c + i_g * g_g
        h = o_g * jnp.tanh(c)
    logits = h @ params["w_fc"] + params["b_fc"]
    return jax.nn.log_softmax(logits, axis=1)


if __name__ == "__main__":
    # small-but-valid shapes: B=2, T=104 time samples, C=8 EEG channels, 1 channel
    # (T must be >= 33 + 38 - 1 = 70 for one pool window; here T_pool = 3)
    B, T, C = 2, 104, 8
    key = jax.random.PRNGKey(0)
    kx, kp = jax.random.split(key)
    x = jax.random.normal(kx, (B, T, C, 1), dtype=jnp.float32)
    params = init_params(kp, C)

    out = jax.jit(lambda xin: lstm_eeg_forward(xin, params))(x)
    out = jax.block_until_ready(out)

    assert out.shape == (B, NCLS)
    ref = reference_forward(x, params)
    np.testing.assert_allclose(np.asarray(out), np.asarray(ref), rtol=5e-4, atol=5e-4)
    print("KERNEL_OK")
</pallas_src>

<mosaic_0001>
module attributes {stable_mosaic.version = 11 : i64} {
  func.func @_lstm_eeg_kernel(%arg0: i32, %arg1: memref<1x72x264xf32, #tpu.memory_space<vmem>>, %arg2: memref<264x40xf32, #tpu.memory_space<vmem>>, %arg3: memref<1x40xf32, #tpu.memory_space<vmem>>, %arg4: memref<3x72xf32, #tpu.memory_space<vmem>>, %arg5: memref<40x256xf32, #tpu.memory_space<vmem>>, %arg6: memref<64x256xf32, #tpu.memory_space<vmem>>, %arg7: memref<1x256xf32, #tpu.memory_space<vmem>>, %arg8: memref<64x4xf32, #tpu.memory_space<vmem>>, %arg9: memref<1x4xf32, #tpu.memory_space<vmem>>, %arg10: memref<1x1x4xf32, #tpu.memory_space<vmem>>) attributes {dimension_semantics = [#tpu.dimension_semantics<parallel>], iteration_bounds = array<i64: 2>, scalar_prefetch = 0 : i64, scratch_operands = 0 : i64, tpu.core_type = #tpu.core_type<tc>, window_params = [{transform_indices = @transform_0, window_bounds = array<i64: 1, 72, 264>}, {pipeline_mode = #tpu.pipeline_mode<synchronous>, transform_indices = @transform_1, window_bounds = array<i64: 264, 40>}, {pipeline_mode = #tpu.pipeline_mode<synchronous>, transform_indices = @transform_2, window_bounds = array<i64: 1, 40>}, {pipeline_mode = #tpu.pipeline_mode<synchronous>, transform_indices = @transform_3, window_bounds = array<i64: 3, 72>}, {pipeline_mode = #tpu.pipeline_mode<synchronous>, transform_indices = @transform_4, window_bounds = array<i64: 40, 256>}, {pipeline_mode = #tpu.pipeline_mode<synchronous>, transform_indices = @transform_5, window_bounds = array<i64: 64, 256>}, {pipeline_mode = #tpu.pipeline_mode<synchronous>, transform_indices = @transform_6, window_bounds = array<i64: 1, 256>}, {pipeline_mode = #tpu.pipeline_mode<synchronous>, transform_indices = @transform_7, window_bounds = array<i64: 64, 4>}, {pipeline_mode = #tpu.pipeline_mode<synchronous>, transform_indices = @transform_8, window_bounds = array<i64: 1, 4>}, {transform_indices = @transform_9, window_bounds = array<i64: 1, 1, 4>}]} {
    %c0 = arith.constant 0 : index
    %c0_0 = arith.constant 0 : index
    %c0_1 = arith.constant 0 : index
    %0 = vector.load %arg1[%c0, %c0_0, %c0_1] : memref<1x72x264xf32, #tpu.memory_space<vmem>>, vector<1x72x264xf32>
    %1 = vector.shape_cast %0 : vector<1x72x264xf32> to vector<72x264xf32>
    %c0_2 = arith.constant 0 : index
    %c0_3 = arith.constant 0 : index
    %2 = vector.load %arg2[%c0_2, %c0_3] : memref<264x40xf32, #tpu.memory_space<vmem>>, vector<264x40xf32>
    %cst = arith.constant dense<0.000000e+00> : vector<72x40xf32>
    %3 = tpu.matmul %1, %2, %cst {dimension_numbers = #tpu.dot_dimension_numbers<[1], [0], [0], [1], [0, 0, 1, 1], [], []>} : vector<72x264xf32>, vector<264x40xf32>, vector<72x40xf32> -> vector<72x40xf32>
    %c0_4 = arith.constant 0 : index
    %c0_5 = arith.constant 0 : index
    %4 = vector.load %arg3[%c0_4, %c0_5] : memref<1x40xf32, #tpu.memory_space<vmem>>, vector<1x40xf32>
    %5 = vector.broadcast %4 : vector<1x40xf32> to vector<72x40xf32>
    %6 = arith.addf %3, %5 : vector<72x40xf32>
    %cst_6 = arith.constant 0.000000e+00 : f32
    %7 = vector.broadcast %cst_6 : f32 to vector<72x40xf32>
    %8 = arith.cmpf ogt, %6, %7 : vector<72x40xf32>
    %cst_7 = arith.constant 0.000000e+00 : f32
    %9 = vector.broadcast %cst_7 : f32 to vector<72x40xf32>
    %10 = arith.minimumf %6, %9 : vector<72x40xf32>
    %11 = math.exp %10 : vector<72x40xf32>
    %cst_8 = arith.constant 1.000000e+00 : f32
    %12 = vector.broadcast %cst_8 : f32 to vector<72x40xf32>
    %13 = arith.subf %11, %12 : vector<72x40xf32>
    %14 = arith.select %8, %6, %13 : vector<72x40xi1>, vector<72x40xf32>
    %c0_9 = arith.constant 0 : index
    %c0_10 = arith.constant 0 : index
    %15 = vector.load %arg4[%c0_9, %c0_10] : memref<3x72xf32, #tpu.memory_space<vmem>>, vector<3x72xf32>
    %cst_11 = arith.constant dense<0.000000e+00> : vector<3x40xf32>
    %16 = tpu.matmul %15, %14, %cst_11 {dimension_numbers = #tpu.dot_dimension_numbers<[1], [0], [0], [1], [0, 0, 1, 1], [], []>} : vector<3x72xf32>, vector<72x40xf32>, vector<3x40xf32> -> vector<3x40xf32>
    %c0_12 = arith.constant 0 : index
    %c0_13 = arith.constant 0 : index
    %17 = vector.load %arg5[%c0_12, %c0_13] : memref<40x256xf32, #tpu.memory_space<vmem>>, vector<40x256xf32>
    %cst_14 = arith.constant dense<0.000000e+00> : vector<3x256xf32>
    %18 = tpu.matmul %16, %17, %cst_14 {dimension_numbers = #tpu.dot_dimension_numbers<[1], [0], [0], [1], [0, 0, 1, 1], [], []>} : vector<3x40xf32>, vector<40x256xf32>, vector<3x256xf32> -> vector<3x256xf32>
    %c0_15 = arith.constant 0 : index
    %c0_16 = arith.constant 0 : index
    %19 = vector.load %arg7[%c0_15, %c0_16] : memref<1x256xf32, #tpu.memory_space<vmem>>, vector<1x256xf32>
    %20 = vector.broadcast %19 : vector<1x256xf32> to vector<3x256xf32>
    %21 = arith.addf %18, %20 : vector<3x256xf32>
    %c0_17 = arith.constant 0 : index
    %c0_18 = arith.constant 0 : index
    %22 = vector.load %arg6[%c0_17, %c0_18] : memref<64x256xf32, #tpu.memory_space<vmem>>, vector<64x256xf32>
    %cst_19 = arith.constant 0.000000e+00 : f32
    %23 = vector.broadcast %cst_19 : f32 to vector<1x64xf32>
    %cst_20 = arith.constant 0.000000e+00 : f32
    %24 = vector.broadcast %cst_20 : f32 to vector<1x64xf32>
    %25 = vector.extract_strided_slice %21 {offsets = [0, 0], sizes = [1, 256], strides = [1, 1]} : vector<3x256xf32> to vector<1x256xf32>
    %cst_21 = arith.constant dense<0.000000e+00> : vector<1x256xf32>
    %26 = tpu.matmul %23, %22, %cst_21 {dimension_numbers = #tpu.dot_dimension_numbers<[1], [0], [0], [1], [0, 0, 1, 1], [], []>} : vector<1x64xf32>, vector<64x256xf32>, vector<1x256xf32> -> vector<1x256xf32>
    %27 = arith.addf %25, %26 : vector<1x256xf32>
    %28 = vector.extract_strided_slice %27 {offsets = [0, 0], sizes = [1, 192], strides = [1, 1]} : vector<1x256xf32> to vector<1x192xf32>
    %29 = arith.negf %28 : vector<1x192xf32>
    %30 = math.exp %29 : vector<1x192xf32>
    %cst_22 = arith.constant 1.000000e+00 : f32
    %31 = vector.broadcast %cst_22 : f32 to vector<1x192xf32>
    %32 = arith.addf %31, %30 : vector<1x192xf32>
    %33 = arith.divf %31, %32 : vector<1x192xf32>
    %34 = vector.extract_strided_slice %27 {offsets = [0, 192], sizes = [1, 64], strides = [1, 1]} : vector<1x256xf32> to vector<1x64xf32>
    %35 = math.tanh %34 : vector<1x64xf32>
    %36 = vector.extract_strided_slice %33 {offsets = [0, 0], sizes = [1, 64], strides = [1, 1]} : vector<1x192xf32> to vector<1x64xf32>
    %37 = vector.extract_strided_slice %33 {offsets = [0, 64], sizes = [1, 64], strides = [1, 1]} : vector<1x192xf32> to vector<1x64xf32>
    %38 = vector.extract_strided_slice %33 {offsets = [0, 128], sizes = [1, 64], strides = [1, 1]} : vector<1x192xf32> to vector<1x64xf32>
    %39 = arith.mulf %37, %24 : vector<1x64xf32>
    %40 = arith.mulf %36, %35 : vector<1x64xf32>
    %41 = arith.addf %39, %40 : vector<1x64xf32>
    %42 = math.tanh %41 : vector<1x64xf32>
    %43 = arith.mulf %38, %42 : vector<1x64xf32>
    %44 = vector.extract_strided_slice %21 {offsets = [1, 0], sizes = [1, 256], strides = [1, 1]} : vector<3x256xf32> to vector<1x256xf32>
    %cst_23 = arith.constant dense<0.000000e+00> : vector<1x256xf32>
    %45 = tpu.matmul %43, %22, %cst_23 {dimension_numbers = #tpu.dot_dimension_numbers<[1], [0], [0], [1], [0, 0, 1, 1], [], []>} : vector<1x64xf32>, vector<64x256xf32>, vector<1x256xf32> -> vector<1x256xf32>
    %46 = arith.addf %44, %45 : vector<1x256xf32>
    %47 = vector.extract_strided_slice %46 {offsets = [0, 0], sizes = [1, 192], strides = [1, 1]} : vector<1x256xf32> to vector<1x192xf32>
    %48 = arith.negf %47 : vector<1x192xf32>
    %49 = math.exp %48 : vector<1x192xf32>
    %cst_24 = arith.constant 1.000000e+00 : f32
    %50 = vector.broadcast %cst_24 : f32 to vector<1x192xf32>
    %51 = arith.addf %50, %49 : vector<1x192xf32>
    %52 = arith.divf %50, %51 : vector<1x192xf32>
    %53 = vector.extract_strided_slice %46 {offsets = [0, 192], sizes = [1, 64], strides = [1, 1]} : vector<1x256xf32> to vector<1x64xf32>
    %54 = math.tanh %53 : vector<1x64xf32>
    %55 = vector.extract_strided_slice %52 {offsets = [0, 0], sizes = [1, 64], strides = [1, 1]} : vector<1x192xf32> to vector<1x64xf32>
    %56 = vector.extract_strided_slice %52 {offsets = [0, 64], sizes = [1, 64], strides = [1, 1]} : vector<1x192xf32> to vector<1x64xf32>
    %57 = vector.extract_strided_slice %52 {offsets = [0, 128], sizes = [1, 64], strides = [1, 1]} : vector<1x192xf32> to vector<1x64xf32>
    %58 = arith.mulf %56, %41 : vector<1x64xf32>
    %59 = arith.mulf %55, %54 : vector<1x64xf32>
    %60 = arith.addf %58, %59 : vector<1x64xf32>
    %61 = math.tanh %60 : vector<1x64xf32>
    %62 = arith.mulf %57, %61 : vector<1x64xf32>
    %63 = vector.extract_strided_slice %21 {offsets = [2, 0], sizes = [1, 256], strides = [1, 1]} : vector<3x256xf32> to vector<1x256xf32>
    %cst_25 = arith.constant dense<0.000000e+00> : vector<1x256xf32>
    %64 = tpu.matmul %62, %22, %cst_25 {dimension_numbers = #tpu.dot_dimension_numbers<[1], [0], [0], [1], [0, 0, 1, 1], [], []>} : vector<1x64xf32>, vector<64x256xf32>, vector<1x256xf32> -> vector<1x256xf32>
    %65 = arith.addf %63, %64 : vector<1x256xf32>
    %66 = vector.extract_strided_slice %65 {offsets = [0, 0], sizes = [1, 192], strides = [1, 1]} : vector<1x256xf32> to vector<1x192xf32>
    %67 = arith.negf %66 : vector<1x192xf32>
    %68 = math.exp %67 : vector<1x192xf32>
    %cst_26 = arith.constant 1.000000e+00 : f32
    %69 = vector.broadcast %cst_26 : f32 to vector<1x192xf32>
    %70 = arith.addf %69, %68 : vector<1x192xf32>
    %71 = arith.divf %69, %70 : vector<1x192xf32>
    %72 = vector.extract_strided_slice %65 {offsets = [0, 192], sizes = [1, 64], strides = [1, 1]} : vector<1x256xf32> to vector<1x64xf32>
    %73 = math.tanh %72 : vector<1x64xf32>
    %74 = vector.extract_strided_slice %71 {offsets = [0, 0], sizes = [1, 64], strides = [1, 1]} : vector<1x192xf32> to vector<1x64xf32>
    %75 = vector.extract_strided_slice %71 {offsets = [0, 64], sizes = [1, 64], strides = [1, 1]} : vector<1x192xf32> to vector<1x64xf32>
    %76 = vector.extract_strided_slice %71 {offsets = [0, 128], sizes = [1, 64], strides = [1, 1]} : vector<1x192xf32> to vector<1x64xf32>
    %77 = arith.mulf %75, %60 : vector<1x64xf32>
    %78 = arith.mulf %74, %73 : vector<1x64xf32>
    %79 = arith.addf %77, %78 : vector<1x64xf32>
    %80 = math.tanh %79 : vector<1x64xf32>
    %81 = arith.mulf %76, %80 : vector<1x64xf32>
    %c0_27 = arith.constant 0 : index
    %c0_28 = arith.constant 0 : index
    %82 = vector.load %arg8[%c0_27, %c0_28] : memref<64x4xf32, #tpu.memory_space<vmem>>, vector<64x4xf32>
    %cst_29 = arith.constant dense<0.000000e+00> : vector<1x4xf32>
    %83 = tpu.matmul %81, %82, %cst_29 {dimension_numbers = #tpu.dot_dimension_numbers<[1], [0], [0], [1], [0, 0, 1, 1], [], []>} : vector<1x64xf32>, vector<64x4xf32>, vector<1x4xf32> -> vector<1x4xf32>
    %c0_30 = arith.constant 0 : index
    %c0_31 = arith.constant 0 : index
    %84 = vector.load %arg9[%c0_30, %c0_31] : memref<1x4xf32, #tpu.memory_space<vmem>>, vector<1x4xf32>
    %85 = arith.addf %83, %84 : vector<1x4xf32>
    %cst_32 = arith.constant dense<0xFF800000> : vector<1xf32>
    %86 = vector.multi_reduction <maximumf>, %85, %cst_32 [1] : vector<1x4xf32> to vector<1xf32>
    %87 = vector.shape_cast %86 : vector<1xf32> to vector<1x1xf32>
    %88 = vector.broadcast %87 : vector<1x1xf32> to vector<1x4xf32>
    %89 = arith.subf %85, %88 : vector<1x4xf32>
    %90 = math.exp %89 : vector<1x4xf32>
    %cst_33 = arith.constant dense<0.000000e+00> : vector<1xf32>
    %91 = vector.multi_reduction <add>, %90, %cst_33 [1] : vector<1x4xf32> to vector<1xf32>
    %92 = vector.shape_cast %91 : vector<1xf32> to vector<1x1xf32>
    %93 = math.log %92 : vector<1x1xf32>
    %94 = vector.broadcast %93 : vector<1x1xf32> to vector<1x4xf32>
    %95 = arith.subf %89, %94 : vector<1x4xf32>
    %c0_34 = arith.constant 0 : index
    %c0_35 = arith.constant 0 : index
    %c0_36 = arith.constant 0 : index
    %96 = vector.load %arg10[%c0_34, %c0_35, %c0_36] : memref<1x1x4xf32, #tpu.memory_space<vmem>>, vector<1x1x4xf32>
    %97 = vector.shape_cast %96 : vector<1x1x4xf32> to vector<1x4xf32>
    %98 = vector.shape_cast %95 : vector<1x4xf32> to vector<1x1x4xf32>
    tpu.vector_store %arg10[%c0_34, %c0_35, %c0_36], %98 {strides = array<i32>} : memref<1x1x4xf32, #tpu.memory_space<vmem>>, vector<1x1x4xf32>,
    return
  }
  func.func @transform_0(%arg0: i32) -> (i32, i32, i32) {
    %c0_i32 = arith.constant 0 : i32
    %c0_i32_0 = arith.constant 0 : i32
    %c0_i32_1 = arith.constant 0 : i32
    return %arg0, %c0_i32, %c0_i32_0 : i32, i32, i32
  }
  func.func @transform_1(%arg0: i32) -> (i32, i32) {
    %c0_i32 = arith.constant 0 : i32
    %c0_i32_0 = arith.constant 0 : i32
    %c0_i32_1 = arith.constant 0 : i32
    return %c0_i32, %c0_i32_0 : i32, i32
  }
  func.func @transform_2(%arg0: i32) -> (i32, i32) {
    %c0_i32 = arith.constant 0 : i32
    %c0_i32_0 = arith.constant 0 : i32
    %c0_i32_1 = arith.constant 0 : i32
    return %c0_i32, %c0_i32_0 : i32, i32
  }
  func.func @transform_3(%arg0: i32) -> (i32, i32) {
    %c0_i32 = arith.constant 0 : i32
    %c0_i32_0 = arith.constant 0 : i32
    %c0_i32_1 = arith.constant 0 : i32
    return %c0_i32, %c0_i32_0 : i32, i32
  }
  func.func @transform_4(%arg0: i32) -> (i32, i32) {
    %c0_i32 = arith.constant 0 : i32
    %c0_i32_0 = arith.constant 0 : i32
    %c0_i32_1 = arith.constant 0 : i32
    return %c0_i32, %c0_i32_0 : i32, i32
  }
  func.func @transform_5(%arg0: i32) -> (i32, i32) {
    %c0_i32 = arith.constant 0 : i32
    %c0_i32_0 = arith.constant 0 : i32
    %c0_i32_1 = arith.constant 0 : i32
    return %c0_i32, %c0_i32_0 : i32, i32
  }
  func.func @transform_6(%arg0: i32) -> (i32, i32) {
    %c0_i32 = arith.constant 0 : i32
    %c0_i32_0 = arith.constant 0 : i32
    %c0_i32_1 = arith.constant 0 : i32
    return %c0_i32, %c0_i32_0 : i32, i32
  }
  func.func @transform_7(%arg0: i32) -> (i32, i32) {
    %c0_i32 = arith.constant 0 : i32
    %c0_i32_0 = arith.constant 0 : i32
    %c0_i32_1 = arith.constant 0 : i32
    return %c0_i32, %c0_i32_0 : i32, i32
  }
  func.func @transform_8(%arg0: i32) -> (i32, i32) {
    %c0_i32 = arith.constant 0 : i32
    %c0_i32_0 = arith.constant 0 : i32
    %c0_i32_1 = arith.constant 0 : i32
    return %c0_i32, %c0_i32_0 : i32, i32
  }
  func.func @transform_9(%arg0: i32) -> (i32, i32, i32) {
    %c0_i32 = arith.constant 0 : i32
    %c0_i32_0 = arith.constant 0 : i32
    %c0_i32_1 = arith.constant 0 : i32
    return %arg0, %c0_i32, %c0_i32_0 : i32, i32, i32
  }
}

</mosaic_0001>

<bundles_post_ra>
// kernel: _lambda_.1
= control target key start
LH: loop header
LB: loop body
LE: loop exit
PB: predicated region body
PF: predicated region fallthrough
CT: control target
= control target key end

     0   :  { %14 = vsyncpa [#allocation3], 0  ;;  %s2251_s0 = inlined_call_operand.vmem [shape: f32[2,72,264], index: 0, kind: input, shape index: {}]   ;;  %s2252_s1 = inlined_call_operand.vmem [shape: f32[264,40], index: 1, kind: input, shape index: {}]   ;;  %s2253_s2 = inlined_call_operand.vmem [shape: f32[1,40], index: 2, kind: input, shape index: {}]   ;;  %s2254_s3 = inlined_call_operand.vmem [shape: f32[3,72], index: 3, kind: input, shape index: {}]   ;;  %s2255_s4 = inlined_call_operand.vmem [shape: f32[40,256], index: 4, kind: input, shape index: {}]   ;;  %s2256_s5 = inlined_call_operand.vmem [shape: f32[64,256], index: 5, kind: input, shape index: {}]   ;;  %s2257_s6 = inlined_call_operand.vmem [shape: f32[1,256], index: 6, kind: input, shape index: {}]   ;;  %s2258_s7 = inlined_call_operand.vmem [shape: f32[64,4], index: 7, kind: input, shape index: {}]   ;;  %s2259_s8 = inlined_call_operand.vmem [shape: f32[1,4], index: 8, kind: input, shape index: {}]   ;;  %s2260_s9 = inlined_call_operand.hbm [shape: f32[2,1,4], index: 9, kind: output, shape index: {}]  }
   0x1   :  { %16 = vsyncpa [#allocation3 + $0x1], 0  ;;  %s1802_s30 = smov 0   ;;  %s1804_s10 = smov 0  }
   0x2   :  { %s1806_s11 = smov 0   ;;  %s1808_s12 = smov 0  }
   0x3 LB: > { %s1823_s13 = sadd.s32 4294967295, %s1746_s12   ;;  %s1390_s14 = sadd.s32 4294967294, %s1746_s12   ;;  %s1746_s12 = sphi %s1808_s12, %s2266_s12   ;;  %s1742_s11 = sphi %s1806_s11, %s2265_s11   ;;  %s1738_s10 = sphi %s1804_s10, %s2264_s10   ;;  %s1734_s30 = sphi %s1802_s30, %s2263_s30  }
   0x4   : > { %s1827_s15 = sadd.s32 1, %s1746_s12   ;;  %s223_s16 = sadd.s32 1, %s1742_s11 }
   0x5   : > { %s220_s17 = ssub.s32 %s1746_s12, %s1827_s15  ;;  %p233_p0 = scmp.ne.s32.totalorder %s1742_s11, %s1738_s10 }
   0x6   : > { %p221_p1 = scmp.eq.s32.totalorder %s220_s17, 0  ;;  %p234_p2 = scmp.eq.s32.totalorder %s1823_s13, 1 }
   0x7   : > { %p239_p3 = scmp.ne.s32.totalorder %s1738_s10, %s1734_s30  ;;  %p240_p4 = scmp.eq.s32.totalorder %s1390_s14, 1 }
   0x8   : > { %s1838_s18 = scalar_select %p221_p1, %s1742_s11, %s223_s16  }
   0x9   : > { %p1840_p5 = por %p234_p2, %p233_p0  ;;  %p1844_p6 = por %p240_p4, %p239_p3 }
   0xa   : > { %p1393_p7 = scmp.ge.s32.totalorder %s1746_s12, 1  ;;  %p290_p8 = scmp.lt.s32.totalorder %s1746_s12, 3 }
   0xc   : > { %p291_p9 = pnand %p1393_p7, %p290_p8 }
   0xd   : > { %p325_p10 = scmp.lt.s32.totalorder (!%p291_p9), %s1823_s13, 1  ;;  %s1425_s29 = sshll.u32 (!%p291_p9), %s1823_s13, 4 }
   0xe   : > { %294 = sbr.rel (%p291_p9) target bundleno = 2790 (0xae6), region = 56  ;;  %s1751_s27 = smov (!%p291_p9), [#allocation2]  }
   0xf   : > { %s1690_s28 = sshll.u32 (!%p291_p9), %s1751_s27, 4  ;;  %s1691_s28 = int_to_ptr.vmem [resolvable:$false] %s1690_s28 }
  0x13   : > { %v388_v0 = vld [vmem:[%s2252_s1 + $0xf8] sm:$0xff]  ;;  %v387_v2 = vld [vmem:[%s2252_s1 + $0xf0] sm:$0xff]  ;;  %v1748_v4 = vmov 0.0   ;;  %v386_v5 = vld [vmem:[%s2252_s1 + $0xe8] sm:$0xff]  ;;  %s326_s16 = scalar_select %p325_p10, %s1823_s13, 1  ;;  %vm1749_vm0 = vmmov 0  }
  0x14   : > { %v372_v1 = vld [vmem:[%s2252_s1 + $0x78] sm:$0xff]  ;;  %1428 = vmatprep.subr.mxu0 %v388_v0  ;;  %v371_v3 = vld [vmem:[%s2252_s1 + $0x70] sm:$0xff]  ;;  %1516 = vmatprep.subr.mxu1 %v1748_v4  ;;  %v370_v6 = vld [vmem:[%s2252_s1 + $0x68] sm:$0xff]  ;;  %vm397_vm1 = vcmask 64512   ;;  %vm700_vm11 = vcmask 588800   ;;  %vm796_vm12 = vcmask 326656  }
  0x15   : > { %1429 = vmatpush3.msra.mxu0 %v372_v1  ;;  %1518 = vmatprep.mubr.msk.f32.mxu1 %vm1749_vm0, %v1748_v4  ;;  %v385_v7 = vld [vmem:[%s2252_s1 + $0xe0] sm:$0xff]  ;;  %s1585_s24 = smul.u32 216, %s326_s16  ;;  %v384_v9 = vld [vmem:[%s2252_s1 + $0xd8] sm:$0xff]  ;;  %v383_v11 = vld [vmem:[%s2252_s1 + $0xd0] sm:$0xff]  ;;  %s1750_s16 = smov 64   ;;  %vm887_vm13 = vcmask 523264  }
  0x16   : > { %1430 = vmatprep.subr.mxu0 %v387_v2  ;;  %v369_v8 = vld [vmem:[%s2252_s1 + $0x60] sm:$0xff]  ;;  %v368_v10 = vld [vmem:[%s2252_s1 + $0x58] sm:$0xff]  ;;  %v367_v12 = vld [vmem:[%s2252_s1 + $0x50] sm:$0xff]  ;;  %vm1308_vm14 = vcmask 24576   ;;  %s1692_s13 = scalar_lea.vmem %s1691_s28, 32 }
  0x17   : > { %1431 = vmatpush3.msra.mxu0 %v371_v3  ;;  %s1888_s22 = scalar_lea.vmem %s2251_s0, %s1585_s24  ;;  %v382_v13 = vld [vmem:[%s2252_s1 + $0xc8] sm:$0xff]  ;;  %v389_v16 = vld [vmem:[%s2252_s1 + $0x100] sm:$0xff]  ;;  %v380_v20 = vld [vmem:[%s2252_s1 + $0xb8] sm:$0xff] }
  0x18   : > { %1432 = vmatprep.subr.mxu0 %v386_v5  ;;  %v331_v14 = vld [vmem:[%s1888_s22 + $0x8] sm:$0xff]  ;;  %v381_v17 = vld [vmem:[%s2252_s1 + $0xc0] sm:$0xff]  ;;  %1517 = vmatpush3.msra.mxu1 %v389_v16  ;;  %v332_v18 = vld [vmem:[%s1888_s22 + $0x10] sm:$0xff] }
  0x19   : > { %1433 = vmatpush3.msra.mxu0 %v370_v6  ;;  %v366_v15 = vld [vmem:[%s2252_s1 + $0x48] sm:$0xff]  ;;  %489 = vmatprep.mubr.f32.mxu0 %v331_v14  ;;  %v365_v19 = vld [vmem:[%s2252_s1 + $0x40] sm:$0xff]  ;;  %v364_v22 = vld [vmem:[%s2252_s1 + $0x38] sm:$0xff] }
  0x1a   : > { %1434 = vmatprep.subr.mxu0 %v385_v7  ;;  %1519 = vmatmul.mubr.msk.f32.vlgmr.msra.gmra.mxu1 %vm397_vm1, %v332_v18  ;;  %v335_v21 = vld [vmem:[%s1888_s22 + $0x28] sm:$0xff]  ;;  %v379_v23 = vld [vmem:[%s2252_s1 + $0xb0] sm:$0xff]  ;;  %v338_v26 = vld [vmem:[%s1888_s22 + $0x40] sm:$0xff] }
  0x1b   : > { %1435 = vmatpush3.msra.mxu0 %v369_v8  ;;  %1521 = vmatprep.mubr.msk.f32.mxu1 %vm1749_vm0, %v1748_v4  ;;  %v363_v24 = vld [vmem:[%s2252_s1 + $0x30] sm:$0xff]  ;;  %v378_v25 = vld [vmem:[%s2252_s1 + $0xa8] sm:$0xff]  ;;  %v377_v28 = vld [vmem:[%s2252_s1 + $0xa0] sm:$0xff] }
  0x1c   : > { %1436 = vmatprep.subr.mxu0 %v384_v9  ;;  %1545 = vmatprep.subr.mxu1 %v1748_v4  ;;  %v362_v27 = vld [vmem:[%s2252_s1 + $0x28] sm:$0xff]  ;;  %v361_v29 = vld [vmem:[%s2252_s1 + $0x20] sm:$0xff]  ;;  %v376_v30 = vld [vmem:[%s2252_s1 + $0x98] sm:$0xff] }
  0x1d   : > { %1437 = vmatpush3.msra.mxu0 %v368_v10  ;;  %v341_v31 = vld [vmem:[%s1888_s22 + $0x58] sm:$0xff]  ;;  %v375_v33 = vld [vmem:[%s2252_s1 + $0x90] sm:$0xff]  ;;  %v374_v35 = vld [vmem:[%s2252_s1 + $0x88] sm:$0xff] }
  0x1e   : > { %1438 = vmatprep.subr.mxu0 %v383_v11  ;;  %1522 = vmatmul.mubr.msk.f32.gmra.mxu1 %vm397_vm1, %v335_v21  ;;  %v360_v32 = vld [vmem:[%s2252_s1 + $0x18] sm:$0xff]  ;;  %v359_v34 = vld [vmem:[%s2252_s1 + $0x10] sm:$0xff]  ;;  %v358_v37 = vld [vmem:[%s2252_s1 + $0x8] sm:$0xff] }
  0x1f   : > { %1439 = vmatpush3.msra.mxu0 %v367_v12  ;;  %1524 = vmatprep.mubr.msk.f32.mxu1 %vm1749_vm0, %v1748_v4  ;;  %v344_v36 = vld [vmem:[%s1888_s22 + $0x70] sm:$0xff]  ;;  %v373_v38 = vld [vmem:[%s2252_s1 + $0x80] sm:$0xff]  ;;  %v347_v41 = vld [vmem:[%s1888_s22 + $0x88] sm:$0xff] }
  0x20   : > { %1440 = vmatprep.subr.mxu0 %v382_v13  ;;  %v357_v39 = vld [vmem:[%s2252_s1] sm:$0xff]  ;;  %v333_v43 = vld [vmem:[%s1888_s22 + $0x18] sm:$0xff]  ;;  %v336_v46 = vld [vmem:[%s1888_s22 + $0x30] sm:$0xff] }
  0x21   : > { %1441 = vmatpush3.msra.mxu0 %v366_v15  ;;  %v330_v40 = vld [vmem:[%s1888_s22] sm:$0xff]  ;;  %v337_v45 = vld [vmem:[%s1888_s22 + $0x38] sm:$0xff]  ;;  %v340_v48 = vld [vmem:[%s1888_s22 + $0x50] sm:$0xff] }
  0x22   : > { %1442 = vmatprep.subr.mxu0 %v381_v17  ;;  %1525 = vmatmul.mubr.msk.f32.gmra.mxu1 %vm397_vm1, %v338_v26  ;;  %v334_v42 = vld [vmem:[%s1888_s22 + $0x20] sm:$0xff]  ;;  %v353_v47 = vld [vmem:[%s1888_s22 + $0xb8] sm:$0xff]  ;;  %v339_v49 = vld [vmem:[%s1888_s22 + $0x48] sm:$0xff] }
  0x23   : > { %1443 = vmatpush3.msra.mxu0 %v365_v19  ;;  %1527 = vmatprep.mubr.msk.f32.mxu1 %vm1749_vm0, %v1748_v4  ;;  %v350_v44 = vld [vmem:[%s1888_s22 + $0xa0] sm:$0xff]  ;;  %v356_v50 = vld [vmem:[%s1888_s22 + $0xd0] sm:$0xff]  ;;  %v343_v51 = vld [vmem:[%s1888_s22 + $0x68] sm:$0xff] }
  0x24   : > { %1444 = vmatprep.subr.mxu0 %v380_v20  ;;  %v342_v52 = vld [vmem:[%s1888_s22 + $0x60] sm:$0xff]  ;;  %v345_v54 = vld [vmem:[%s1888_s22 + $0x78] sm:$0xff]  ;;  %v348_v56 = vld [vmem:[%s1888_s22 + $0x90] sm:$0xff] }
  0x25   : > { %1445 = vmatpush3.msra.mxu0 %v364_v22  ;;  %v346_v53 = vld [vmem:[%s1888_s22 + $0x80] sm:$0xff]  ;;  %v349_v55 = vld [vmem:[%s1888_s22 + $0x98] sm:$0xff]  ;;  %v352_v57 = vld [vmem:[%s1888_s22 + $0xb0] sm:$0xff] }
  0x26   : > { %1446 = vmatprep.subr.mxu0 %v379_v23  ;;  %1528 = vmatmul.mubr.msk.f32.gmra.mxu1 %vm397_vm1, %v341_v31  ;;  %v351_v58 = vld [vmem:[%s1888_s22 + $0xa8] sm:$0xff]  ;;  %v354_v60 = vld [vmem:[%s1888_s22 + $0xc0] sm:$0xff] }
  0x27   : > { %1447 = vmatpush3.msra.mxu0 %v363_v24  ;;  %1530 = vmatprep.mubr.msk.f32.mxu1 %vm1749_vm0, %v1748_v4  ;;  %v355_v59 = vld [vmem:[%s1888_s22 + $0xc8] sm:$0xff]  ;;  %s1333_s22 = scalar_lea.hbm %s2260_s9, %s1425_s29 }
  0x28   : > { %1448 = vmatprep.subr.mxu0 %v378_v25 }
  0x29   : > { %1449 = vmatpush3.msra.mxu0 %v362_v27 }
  0x2a   : > { %1450 = vmatprep.subr.mxu0 %v377_v28  ;;  %1531 = vmatmul.mubr.msk.f32.gmra.mxu1 %vm397_vm1, %v344_v36 }
  0x2b   : > { %1451 = vmatpush3.msra.mxu0 %v361_v29  ;;  %1533 = vmatprep.mubr.msk.f32.mxu1 %vm1749_vm0, %v1748_v4 }
  0x2c   : > { %1452 = vmatprep.subr.mxu0 %v376_v30 }
  0x2d   : > { %1453 = vmatpush3.msra.mxu0 %v360_v32  ;;  %v1395_v32 = vld [vmem:[%s2253_s2] ss:$0 sm:$0xff] }
  0x2e   : > { %1454 = vmatprep.subr.mxu0 %v375_v33  ;;  %1534 = vmatmul.mubr.msk.f32.gmra.mxu1 %vm397_vm1, %v347_v41 }
  0x2f   : > { %1455 = vmatpush3.msra.mxu0 %v359_v34  ;;  %1536 = vmatprep.mubr.msk.f32.mxu1 %vm1749_vm0, %v1748_v4 }
  0x30   : > { %1456 = vmatprep.subr.mxu0 %v374_v35 }
  0x31   : > { %1457 = vmatpush3.msra.mxu0 %v358_v37 }
  0x32   : > { %1458 = vmatprep.subr.mxu0 %v373_v38  ;;  %1537 = vmatmul.mubr.msk.f32.gmra.mxu1 %vm397_vm1, %v350_v44 }
  0x33   : > { %1459 = vmatpush3.msra.mxu0 %v357_v39  ;;  %1539 = vmatprep.mubr.msk.f32.mxu1 %vm1749_vm0, %v1748_v4 }
  0x34   : > { %490 = vmatmul.mubr.f32.vlgmr.msra.gmra.mxu0 %v330_v40 }
  0x35   : > { %494 = vmatprep.mubr.f32.mxu0 %v334_v42 }
  0x36   : > { %1540 = vmatmul.mubr.msk.f32.gmra.mxu1 %vm397_vm1, %v353_v47 }
  0x37   : > { %1542 = vmatprep.mubr.msk.f32.mxu1 %vm1749_vm0, %v1748_v4 }
  0x38   : > { %495 = vmatmul.mubr.f32.gmra.mxu0 %v333_v43 }
  0x39   : > { %499 = vmatprep.mubr.f32.mxu0 %v337_v45 }
  0x3a   : > { %1543 = vmatmul.mubr.msk.f32.gmra.mxu1 %vm397_vm1, %v356_v50 }
  0x3b   : > { %1563 = vmatprep.mubr.msk.f32.mxu1 %vm1749_vm0, %v1748_v4 }
  0x3c   : > { %500 = vmatmul.mubr.f32.gmra.mxu0 %v336_v46 }
  0x3d   : > { %504 = vmatprep.mubr.f32.mxu0 %v340_v48 }
  0x40   : > { %505 = vmatmul.mubr.f32.gmra.mxu0 %v339_v49 }
  0x41   : > { %509 = vmatprep.mubr.f32.mxu0 %v343_v51 }
  0x44   : > { %510 = vmatmul.mubr.f32.gmra.mxu0 %v342_v52 }
  0x45   : > { %514 = vmatprep.mubr.f32.mxu0 %v346_v53 }
  0x48   : > { %515 = vmatmul.mubr.f32.gmra.mxu0 %v345_v54 }
  0x49   : > { %519 = vmatprep.mubr.f32.mxu0 %v349_v55 }
  0x4c   : > { %520 = vmatmul.mubr.f32.gmra.mxu0 %v348_v56 }
  0x4d   : > { %524 = vmatprep.mubr.f32.mxu0 %v352_v57 }
  0x50   : > { %525 = vmatmul.mubr.f32.gmra.mxu0 %v351_v58 }
  0x51   : > { %529 = vmatprep.mubr.f32.mxu0 %v355_v59 }
  0x54   : > { %530 = vmatmul.mubr.f32.gmra.mxu0 %v354_v60 }
  0x55   : > { %1061 = vmatprep.mubr.f32.mxu0 %v1748_v4 }
  0xda   : > { %v2015_v61 = vpop.f32.mrf.mxu1 }
  0xdc   : > { %v1520_v62 = vpop.f32.mrf.mxu1 }
  0xde   : > { %v2017_v63 = vpop.f32.mrf.mxu1 }
  0xe0   : > { %v1523_v0 = vpop.f32.mrf.mxu1 }
  0xe2   : > { %v611_v1 = vpop.f32.mrf.mxu1 }
  0xe4   : > { %v1526_v2 = vpop.f32.mrf.mxu1 }
  0xe6   : > { %v616_v3 = vpop.f32.mrf.mxu1 }
  0xe8   : > { %v1529_v5 = vpop.f32.mrf.mxu1 }
  0xea   : > { %v621_v6 = vpop.f32.mrf.mxu1 }
  0xec   : > { %v1532_v7 = vpop.f32.mrf.mxu1 }
  0xee   : > { %v626_v9 = vpop.f32.mrf.mxu1 }
  0xf0   : > { %v1535_v11 = vpop.f32.mrf.mxu1 }
  0xf2   : > { %v631_v13 = vpop.f32.mrf.mxu1 }
  0xf4   : > { %v1460_v8 = vpop.f32.mrf.mxu0  ;;  %v1538_v15 = vpop.f32.mrf.mxu1 }
  0xf6   : > { %v1461_v10 = vpop.f32.mrf.mxu0  ;;  %v636_v17 = vpop.f32.mrf.mxu1 }
  0xf7   : > { %v1462_v51 = vadd.f32 %v1461_v10, %v1460_v8 }
  0xf8   : > { %v1463_v12 = vpop.f32.mrf.mxu0  ;;  %v1541_v19 = vpop.f32.mrf.mxu1 }
  0xf9   : > { %v492_v2 = vadd.f32 %v1462_v51, %v1395_v32  ;;  %v777_v51 = vld [vmem:[%s2255_s4 + $0x18] sm:$0xff] }
  0xfa   : > { %v1464_v14 = vpop.f32.mrf.mxu0  ;;  %v641_v21 = vpop.f32.mrf.mxu1 }
  0xfb   : > { %v1465_v45 = vadd.f32 %v1464_v14, %v1463_v12  ;;  %v2040_v11 = vadd.f32 %v2015_v61, %v492_v2  ;;  %v878_v2 = vld [vmem:[%s2256_s5 + $0x38] sm:$0xff] }
  0xfc   : > { %v1466_v16 = vpop.f32.mrf.mxu0  ;;  %v1544_v23 = vpop.f32.mrf.mxu1 }
  0xfd   : > { %v497_v57 = vadd.f32 %v1465_v45, %v1395_v32  ;;  %vm645_vm10 = vcmp.gt.f32.partialorder %v2040_v11, 0.0 }
  0xfe   : > { %v1467_v18 = vpop.f32.mrf.mxu0 }
  0xff   : > { %v1468_v42 = vadd.f32 %v1467_v18, %v1466_v16 }
 0x100   : > { %v1469_v20 = vpop.f32.mrf.mxu0 }
 0x101   : > { %v502_v53 = vadd.f32 %v1468_v42, %v1395_v32 }
 0x102   : > { %v1470_v22 = vpop.f32.mrf.mxu0 }
 0x103   : > { %v1471_v37 = vadd.f32 %v1470_v22, %v1469_v20  ;;  %v2032_v5 = vadd.f32 %v611_v1, %v502_v53  ;;  %v775_v53 = vld [vmem:[%s2255_s4 + $0x8] sm:$0xff] }
 0x104   : > { %v1472_v24 = vpop.f32.mrf.mxu0 }
 0x105   : > { %v507_v47 = vadd.f32 %v1471_v37, %v1395_v32  ;;  %v656_v12 = vmin.f32 %v2032_v5, 0.0  ;;  %vm647_vm8 = vcmp.gt.f32.partialorder %v2032_v5, 0.0 }
 0x106   : > { %v1473_v25 = vpop.f32.mrf.mxu0 }
 0x107   : > { %v1474_v34 = vadd.f32 %v1473_v25, %v1472_v24  ;;  %v2029_v58 = vadd.f32 %v616_v3, %v507_v47  ;;  %v667_v15 = vmul.f32 1.442695, %v656_v12  ;;  %v781_v47 = vld [vmem:[%s2255_s4 + $0x38] sm:$0xff] }
 0x108   : > { %v1475_v26 = vpop.f32.mrf.mxu0 }
 0x109   : > { %v512_v43 = vadd.f32 %v1474_v34, %v1395_v32  ;;  %vm648_vm7 = vcmp.gt.f32.partialorder %v2029_v58, 0.0 }
 0x10a   : > { %v1476_v27 = vpop.f32.mrf.mxu0 }
 0x10b   : > { %v1477_v30 = vadd.f32 %v1476_v27, %v1475_v26  ;;  %v2027_v54 = vadd.f32 %v621_v6, %v512_v43  ;;  %v657_v6 = vmin.f32 %v2029_v58, 0.0  ;;  %v699_v43 = vld [vmem:[%s2254_s3] sm:$0x7] }
 0x10c   : > { %v1478_v28 = vpop.f32.mrf.mxu0 }
 0x10d   : > { %v517_v38 = vadd.f32 %v1477_v30, %v1395_v32  ;;  %v658_v7 = vmin.f32 %v2027_v54, 0.0  ;;  %v669_v14 = vmul.f32 1.442695, %v657_v6  ;;  %vm649_vm6 = vcmp.gt.f32.partialorder %v2027_v54, 0.0  ;;  %v873_v6 = vld [vmem:[%s2256_s5 + $0x10] sm:$0xff] }
 0x10e   : > { %v1479_v29 = vpop.f32.mrf.mxu0 }
 0x10f   : > { %v1480_v31 = vadd.f32 %v1479_v29, %v1478_v28  ;;  %v2024_v48 = vadd.f32 %v626_v9, %v517_v38  ;;  %v2036_v9 = vadd.f32 %v2017_v63, %v497_v57  ;;  %v654_v63 = vmin.f32 %v2040_v11, 0.0  ;;  %v884_v57 = vld [vmem:[%s2256_s5 + $0x68] sm:$0xff] }
 0x110   : > { %v1481_v33 = vpop.f32.mrf.mxu0 }
 0x111   : > { %v522_v35 = vadd.f32 %v1480_v31, %v1395_v32  ;;  %v659_v59 = vmin.f32 %v2024_v48, 0.0  ;;  %v655_v1 = vmin.f32 %v2036_v9, 0.0  ;;  %vm650_vm5 = vcmp.gt.f32.partialorder %v2024_v48, 0.0 }
 0x112   : > { %v1482_v36 = vpop.f32.mrf.mxu0  ;;  %vm646_vm9 = vcmp.gt.f32.partialorder %v2036_v9, 0.0 }
 0x113   : > { %v1483_v39 = vadd.f32 %v1482_v36, %v1481_v33  ;;  %v2022_v40 = vadd.f32 %v631_v13, %v522_v35  ;;  %v673_v10 = vmul.f32 1.442695, %v659_v59  ;;  %v671_v13 = vmul.f32 1.442695, %v658_v7  ;;  %v882_v59 = vld [vmem:[%s2256_s5 + $0x58] sm:$0xff]  ;;  %v876_v7 = vld [vmem:[%s2256_s5 + $0x28] sm:$0xff] }
 0x114   : > { %v1484_v41 = vpop.f32.mrf.mxu0  ;;  %v665_v16 = vmul.f32 1.442695, %v655_v1 }
 0x115   : > { %v527_v44 = vadd.f32 %v1483_v39, %v1395_v32  ;;  %v660_v52 = vmin.f32 %v2022_v40, 0.0  ;;  %vm651_vm4 = vcmp.gt.f32.partialorder %v2022_v40, 0.0 }
 0x116   : > { %v1485_v46 = vpop.f32.mrf.mxu0 }
 0x117   : > { %v637_v49 = vadd.f32 %v636_v17, %v527_v44  ;;  %v1486_v50 = vadd.f32 %v1485_v46, %v1484_v41  ;;  %v675_v0 = vmul.f32 1.442695, %v660_v52  ;;  %v663_v17 = vmul.f32 1.442695, %v654_v63  ;;  %v783_v44 = vld [vmem:[%s2255_s4 + $0x48] sm:$0xff]  ;;  %v782_v46 = vld [vmem:[%s2255_s4 + $0x40] sm:$0xff] }
 0x118   : > { %v776_v52 = vld [vmem:[%s2255_s4 + $0x10] sm:$0xff] }
 0x119   : > { %v661_v55 = vmin.f32 %v637_v49, 0.0  ;;  %v532_v56 = vadd.f32 %v1486_v50, %v1395_v32  ;;  %vm652_vm3 = vcmp.gt.f32.partialorder %v637_v49, 0.0  ;;  %v778_v50 = vld [vmem:[%s2255_s4 + $0x20] sm:$0xff] }
 0x11b   : > { %v677_v60 = vmul.f32 1.442695, %v661_v55  ;;  %v642_v62 = vadd.f32 %v641_v21, %v532_v56  ;;  %v886_v55 = vld [vmem:[%s2256_s5 + $0x78] sm:$0xff]  ;;  %v885_v56 = vld [vmem:[%s2256_s5 + $0x70] sm:$0xff] }
 0x11c   : > { %1013 = vmatprep.subr.mxu0 %v886_v55 }
 0x11d   : > { %v662_v8 = vmin.f32 %v642_v62, 0.0  ;;  %1628 = vpow2.f32 %v677_v60  ;;  %vm653_vm2 = vcmp.gt.f32.partialorder %v642_v62, 0.0  ;;  %1014 = vmatpush1.msra.mxu0 %v885_v56  ;;  %v881_v60 = vld [vmem:[%s2256_s5 + $0x50] sm:$0xff] }
 0x11e   : > { %1630 = vpow2.f32 %v675_v0  ;;  %1015 = vmatprep.subr.mxu0 %v884_v57  ;;  %v879_v0 = vld [vmem:[%s2256_s5 + $0x40] sm:$0xff] }
 0x11f   : > { %v679_v3 = vmul.f32 1.442695, %v662_v8  ;;  %v875_v8 = vld [vmem:[%s2256_s5 + $0x20] sm:$0xff] }
 0x121   : > { %1632 = vpow2.f32 %v679_v3  ;;  %v871_v3 = vld [vmem:[%s2256_s5] sm:$0xff] }
 0x122   : > { %1634 = vpow2.f32 %v673_v10  ;;  %v872_v10 = vld [vmem:[%s2256_s5 + $0x8] sm:$0xff] }
 0x123   : > { %1636 = vpow2.f32 %v671_v13  ;;  %v786_v13 = vlaneseq }
 0x124   : > { %1638 = vpow2.f32 %v669_v14 }
 0x125   : > { %1640 = vpow2.f32 %v667_v15  ;;  %v787_v1 = vshrl.u32 %v786_v13, 7  ;;  %v784_v15 = vld [vmem:[%s2257_s6] sm:$0x3] }
 0x126   : > { %1642 = vpow2.f32 %v665_v16 }
 0x127   : > { %1644 = vpow2.f32 %v663_v17  ;;  %v792_v14 = vsub.s32 1, %v787_v1 }
 0x129   : > { %v793_v16 = vrot.slane %v784_v15, %v792_v14 }
 0x12a   : > { %v1629_v18 = vpop.eup %1628 }
 0x12b   : > { %v1631_v61 = vpop.eup %1630  ;;  %v1412_v21 = vadd.f32 -1.0, %v1629_v18 }
 0x12c   : > { %v1411_v24 = vadd.f32 -1.0, %v1631_v61 }
 0x12d   : > { %v697_v26 = vsel %vm652_vm3, %v637_v49, %v1412_v21  ;;  %v779_v49 = vld [vmem:[%s2255_s4 + $0x28] sm:$0xff] }
 0x12e   : > { %v1633_v19 = vpop.eup %1632  ;;  %v696_v29 = vsel %vm651_vm4, %v2022_v40, %v1411_v24 }
 0x12f   : > { %v1413_v20 = vadd.f32 -1.0, %v1633_v19  ;;  %v1635_v22 = vpop.eup %1634 }
 0x130   : > { %v1637_v25 = vpop.eup %1636  ;;  %v1410_v27 = vadd.f32 -1.0, %v1635_v22  ;;  %v788_v22 = vsub.s32 0, %v787_v1 }
 0x131   : > { %v698_v23 = vsel %vm653_vm2, %v642_v62, %v1413_v20  ;;  %v1639_v28 = vpop.eup %1638  ;;  %v1409_v30 = vadd.f32 -1.0, %v1637_v25  ;;  %v880_v62 = vld [vmem:[%s2256_s5 + $0x48] sm:$0xff] }
 0x132   : > { %1546 = vmatpush3.msra.mxu1 %v698_v23  ;;  %v1641_v31 = vpop.eup %1640  ;;  %v695_v32 = vsel %vm650_vm5, %v2024_v48, %v1410_v27  ;;  %v1408_v33 = vadd.f32 -1.0, %v1639_v28  ;;  %v780_v48 = vld [vmem:[%s2255_s4 + $0x30] sm:$0xff]  ;;  %v789_v23 = vrot.slane %v784_v15, %v788_v22 }
 0x133   : > { %1547 = vmatprep.subr.mxu1 %v1748_v4  ;;  %v1643_v34 = vpop.eup %1642  ;;  %v694_v35 = vsel %vm649_vm6, %v2027_v54, %v1409_v30  ;;  %v1407_v36 = vadd.f32 -1.0, %v1641_v31  ;;  %v774_v54 = vld [vmem:[%s2255_s4] sm:$0xff]  ;;  %v1227_v22 = vld [vmem:[%s2258_s7 + $0x10] sm:$0xff] }
 0x134   : > { %1548 = vmatpush3.msra.mxu1 %v697_v26  ;;  %v1645_v37 = vpop.eup %1644  ;;  %v693_v38 = vsel %vm648_vm7, %v2029_v58, %v1408_v33  ;;  %v1406_v39 = vadd.f32 -1.0, %v1643_v34  ;;  %v883_v58 = vld [vmem:[%s2256_s5 + $0x60] sm:$0xff] }
 0x135   : > { %1549 = vmatprep.subr.mxu1 %v1748_v4  ;;  %v692_v40 = vsel %vm647_vm8, %v2032_v5, %v1407_v36  ;;  %v1405_v41 = vadd.f32 -1.0, %v1645_v37  ;;  %1016 = vmatpush1.msra.mxu0 %v883_v58  ;;  %v877_v5 = vld [vmem:[%s2256_s5 + $0x30] sm:$0xff] }
 0x136   : > { %1550 = vmatpush3.msra.mxu1 %v696_v29  ;;  %v691_v42 = vsel %vm646_vm9, %v2036_v9, %v1406_v39  ;;  %1017 = vmatprep.subr.mxu0 %v882_v59  ;;  %v874_v9 = vld [vmem:[%s2256_s5 + $0x18] sm:$0xff] }
 0x137   : > { %1551 = vmatprep.subr.mxu1 %v1748_v4  ;;  %v690_v45 = vsel %vm645_vm10, %v2040_v11, %v1405_v41  ;;  %1018 = vmatpush1.msra.mxu0 %v881_v60 }
 0x138   : > { %1552 = vmatpush3.msra.mxu1 %v695_v32  ;;  %1019 = vmatprep.subr.mxu0 %v880_v62 }
 0x139   : > { %1553 = vmatprep.subr.mxu1 %v1748_v4  ;;  %1020 = vmatpush1.msra.mxu0 %v879_v0 }
 0x13a   : > { %1554 = vmatpush3.msra.mxu1 %v694_v35  ;;  %1021 = vmatprep.subr.mxu0 %v878_v2 }
 0x13b   : > { %1555 = vmatprep.subr.mxu1 %v1748_v4  ;;  %1022 = vmatpush1.msra.mxu0 %v877_v5 }
 0x13c   : > { %1556 = vmatpush3.msra.mxu1 %v693_v38  ;;  %1023 = vmatprep.subr.mxu0 %v876_v7 }
 0x13d   : > { %1557 = vmatprep.subr.mxu1 %v1748_v4  ;;  %1024 = vmatpush1.msra.mxu0 %v875_v8 }
 0x13e   : > { %1558 = vmatpush3.msra.mxu1 %v692_v40  ;;  %1025 = vmatprep.subr.mxu0 %v874_v9 }
 0x13f   : > { %1559 = vmatprep.subr.mxu1 %v1748_v4  ;;  %1026 = vmatpush1.msra.mxu0 %v873_v6 }
 0x140   : > { %1560 = vmatpush3.msra.mxu1 %v691_v42  ;;  %1027 = vmatprep.subr.mxu0 %v872_v10 }
 0x141   : > { %1561 = vmatprep.subr.mxu1 %v1748_v4  ;;  %1028 = vmatpush1.msra.mxu0 %v871_v3 }
 0x142   : > { %1562 = vmatpush3.msra.mxu1 %v690_v45  ;;  %1566 = vmatprep.subr.mxu0 %v1748_v4 }
 0x143   : > { %1564 = vmatmul.mubr.msk.f32.vlgmr.msra.gmra.mxu1 %vm700_vm11, %v699_v43  ;;  %822 = vmatprep.subr.mxu1 %v783_v44 }
 0x144   : > { %823 = vmatpush1.msra.mxu1 %v782_v46  ;;  %864 = vmatprep.mubr.f32.mxu1 %v1748_v4 }
 0x145   : > { %824 = vmatprep.subr.mxu1 %v781_v47 }
 0x146   : > { %825 = vmatpush1.msra.mxu1 %v780_v48 }
 0x147   : > { %826 = vmatprep.subr.mxu1 %v779_v49 }
 0x148   : > { %827 = vmatpush1.msra.mxu1 %v778_v50 }
 0x149   : > { %828 = vmatprep.subr.mxu1 %v777_v51 }
 0x14a   : > { %829 = vmatpush1.msra.mxu1 %v776_v52 }
 0x14b   : > { %830 = vmatprep.subr.mxu1 %v775_v53 }
 0x14c   : > { %831 = vmatpush1.msra.mxu1 %v774_v54 }
 0x14d   : > { %907 = vmatprep.subr.mxu1 %v886_v55 }
 0x203   : > { %v770_v11 = vpop.f32.mrf.mxu1 }
 0x204   : > { %1415 = vmatmul.mubr.msk.f32.vlgmr.msra.gmra.mxu1 %vm796_vm12, %v770_v11 }
 0x205   : > { %908 = vmatpush1.msra.mxu1 %v885_v56  ;;  %955 = vmatprep.mubr.f32.mxu1 %v1748_v4  ;;  %v1565_v12 = vpop.f32.mrf.mxu1 }
 0x206   : > { %909 = vmatprep.subr.mxu1 %v884_v57 }
 0x207   : > { %910 = vmatpush1.msra.mxu1 %v883_v58 }
 0x208   : > { %911 = vmatprep.subr.mxu1 %v882_v59 }
 0x209   : > { %912 = vmatpush1.msra.mxu1 %v881_v60 }
 0x20a   : > { %913 = vmatprep.subr.mxu1 %v880_v62 }
 0x20b   : > { %914 = vmatpush1.msra.mxu1 %v879_v0 }
 0x20c   : > { %915 = vmatprep.subr.mxu1 %v878_v2 }
 0x20d   : > { %916 = vmatpush1.msra.mxu1 %v877_v5 }
 0x20e   : > { %917 = vmatprep.subr.mxu1 %v876_v7 }
 0x20f   : > { %918 = vmatpush1.msra.mxu1 %v875_v8 }
 0x210   : > { %919 = vmatprep.subr.mxu1 %v874_v9 }
 0x211   : > { %920 = vmatpush1.msra.mxu1 %v873_v6 }
 0x212   : > { %921 = vmatprep.subr.mxu1 %v872_v10 }
 0x213   : > { %922 = vmatpush1.msra.mxu1 %v871_v3 }
 0x214   : > { %956 = vmatmul.mubr.f32.vlgmr.msra.gmra.mxu1 %v1748_v4  ;;  %1129 = vmatprep.subr.mxu1 %v886_v55 }
 0x215   : > { %1130 = vmatpush1.msra.mxu1 %v885_v56  ;;  %1177 = vmatprep.mubr.f32.mxu1 %v1748_v4 }
 0x216   : > { %1131 = vmatprep.subr.mxu1 %v884_v57 }
 0x217   : > { %1132 = vmatpush1.msra.mxu1 %v883_v58 }
 0x218   : > { %1133 = vmatprep.subr.mxu1 %v882_v59 }
 0x219   : > { %1134 = vmatpush1.msra.mxu1 %v881_v60 }
 0x21a   : > { %1135 = vmatprep.subr.mxu1 %v880_v62 }
 0x21b   : > { %1136 = vmatpush1.msra.mxu1 %v879_v0 }
 0x21c   : > { %1137 = vmatprep.subr.mxu1 %v878_v2 }
 0x21d   : > { %1138 = vmatpush1.msra.mxu1 %v877_v5 }
 0x21e   : > { %1139 = vmatprep.subr.mxu1 %v876_v7 }
 0x21f   : > { %1140 = vmatpush1.msra.mxu1 %v875_v8 }
 0x220   : > { %1141 = vmatprep.subr.mxu1 %v874_v9 }
 0x221   : > { %1142 = vmatpush1.msra.mxu1 %v873_v6 }
 0x222   : > { %1143 = vmatprep.subr.mxu1 %v872_v10 }
 0x223   : > { %1144 = vmatpush1.msra.mxu1 %v871_v3 }
 0x2c4   : > { %v866_v63 = vpop.f32.mrf.mxu1 }
 0x2c5   : > { %v2160_v24 = vadd.f32 %v866_v63, %v789_v23 }
 0x2c6   : > { %v868_v17 = vpop.f32.mrf.mxu1 }
 0x2c7   : > { %v2156_v61 = vadd.f32 %v868_v17, %v793_v16 }
 0x2d4   : > { %v957_v18 = vpop.f32.mrf.mxu1 }
 0x2d5   : > { %v962_v25 = vadd.f32 %v957_v18, %v2160_v24  ;;  %v1232_v18 = vld [vmem:[%s2258_s7 + $0x38] sm:$0xff] }
 0x2d6   : > { %v959_v19 = vpop.f32.mrf.mxu1 }
 0x2d7   : > { %v963_v20 = vadd.f32 %v959_v19, %v2156_v61  ;;  %v1416_v26 = vmul.f32 -1.442695, %v962_v25  ;;  %v1230_v19 = vld [vmem:[%s2258_s7 + $0x28] sm:$0xff] }
 0x2d9   : > { %1646 = vtanh.f32 %v963_v20  ;;  %v1417_v36 = vmul.f32 -1.442695, %v963_v20  ;;  %v1229_v20 = vld [vmem:[%s2258_s7 + $0x20] sm:$0xff] }
 0x2da   : > { %1648 = vpow2.f32 %v1416_v26 }
 0x2e6   : > { %v1647_v21 = vpop.eup %1646 }
 0x2e7   : > { %979 = vrot.lane.b32.xlu0 %v1647_v21, %s1750_s16  ;;  %v1649_v27 = vpop.eup %1648  ;;  %v1228_v21 = vld [vmem:[%s2258_s7 + $0x18] sm:$0xff] }
 0x2e8   : > { %v970_v28 = vadd.f32 1.0, %v1649_v27  ;;  %v1226_v27 = vld [vmem:[%s2258_s7 + $0x8] sm:$0xff] }
 0x2ea   : > { %1650 = vrcp.f32 %v970_v28  ;;  %v1225_v28 = vld [vmem:[%s2258_s7] sm:$0xff] }
 0x2f7   : > { %v1651_v29 = vpop.eup %1650 }
 0x2f8   : > { %v977_v32 = vmul.f32 0.0, %v1651_v29 }
 0x359   : > { %v980_v30 = vpop.permute.xlu0 %979 }
 0x35a   : > { %v982_v31 = vmul.f32 %v1651_v29, %v980_v30 }
 0x35c   : > { %984 = vrot.lane.b32.xlu0 %v982_v31, %s1750_s16 }
 0x3ce   : > { %v985_v33 = vpop.permute.xlu0 %984 }
 0x3cf   : > { %v987_v34 = vadd.f32 %v985_v33, %v977_v32 }
 0x3d1   : > { %1652 = vtanh.f32 %v987_v34  ;;  %v1090_v55 = vrot.slane %v987_v34, 7 }
 0x3d2   : > { %1654 = vpow2.f32 %v1417_v36 }
 0x3de   : > { %v1653_v35 = vpop.eup %1652 }
 0x3df   : > { %990 = vrot.lane.b32.xlu1 %v1653_v35, %s1750_s16  ;;  %v1655_v37 = vpop.eup %1654 }
 0x3e0   : > { %v971_v38 = vadd.f32 1.0, %v1655_v37 }
 0x3e2   : > { %1656 = vrcp.f32 %v971_v38 }
 0x3ef   : > { %v1657_v39 = vpop.eup %1656 }
 0x451   : > { %v991_v40 = vpop.permute.xlu1 %990 }
 0x452   : > { %v993_v41 = vmul.f32 %v1657_v39, %v991_v40 }
 0x454   : > { %1418 = vmatmul.mubr.msk.f32.vlgmr.msra.gmra.mxu0 %vm887_vm13, %v993_v41 }
 0x455   : > { %1582 = vmatprep.mubr.msk.f32.mxu0 %vm1749_vm0, %v1748_v4  ;;  %1567 = vmatpush3.msra.mxu0 %v1232_v18 }
 0x456   : > { %1568 = vmatprep.subr.mxu0 %v1748_v4 }
 0x514   : > { %v1063_v42 = vpop.f32.mrf.mxu0 }
 0x515   : > { %v1070_v47 = vrot.slane %v1063_v42, 7 }
 0x516   : > { %v1065_v43 = vpop.f32.mrf.mxu0 }
 0x517   : > { %v1071_v44 = vrot.slane %v1065_v43, 7  ;;  %v1074_v48 = vadd.f32 %v1070_v47, %v2160_v24 }
 0x519   : > { %v1075_v45 = vadd.f32 %v1071_v44, %v2156_v61  ;;  %v1419_v49 = vmul.f32 -1.442695, %v1074_v48 }
 0x51b   : > { %1658 = vtanh.f32 %v1075_v45  ;;  %v1420_v60 = vmul.f32 -1.442695, %v1075_v45 }
 0x51c   : > { %1660 = vpow2.f32 %v1419_v49 }
 0x528   : > { %v1659_v46 = vpop.eup %1658 }
 0x529   : > { %1094 = vrot.lane.b32.xlu1 %v1659_v46, %s1750_s16  ;;  %v1661_v50 = vpop.eup %1660 }
 0x52a   : > { %v1082_v51 = vadd.f32 1.0, %v1661_v50 }
 0x52c   : > { %1662 = vrcp.f32 %v1082_v51 }
 0x539   : > { %v1663_v52 = vpop.eup %1662 }
 0x53a   : > { %v1092_v56 = vmul.f32 %v1663_v52, %v1090_v55 }
 0x59b   : > { %v1095_v53 = vpop.permute.xlu1 %1094 }
 0x59c   : > { %v1097_v54 = vmul.f32 %v1663_v52, %v1095_v53 }
 0x59e   : > { %1099 = vrot.lane.b32.xlu0 %v1097_v54, %s1750_s16 }
 0x610   : > { %v1100_v57 = vpop.permute.xlu0 %1099 }
 0x611   : > { %v1102_v58 = vadd.f32 %v1100_v57, %v1092_v56 }
 0x613   : > { %1664 = vtanh.f32 %v1102_v58  ;;  %v1206_v23 = vrot.slane %v1102_v58, 7 }
 0x614   : > { %1666 = vpow2.f32 %v1420_v60 }
 0x620   : > { %v1665_v59 = vpop.eup %1664 }
 0x621   : > { %1105 = vrot.lane.b32.xlu1 %v1665_v59, %s1750_s16  ;;  %v1667_v62 = vpop.eup %1666 }
 0x622   : > { %v1083_v0 = vadd.f32 1.0, %v1667_v62 }
 0x624   : > { %1668 = vrcp.f32 %v1083_v0 }
 0x631   : > { %v1669_v2 = vpop.eup %1668 }
 0x693   : > { %v1106_v5 = vpop.permute.xlu1 %1105 }
 0x694   : > { %v1108_v7 = vmul.f32 %v1669_v2, %v1106_v5 }
 0x696   : > { %v1110_v8 = vrot.slane %v1108_v7, 1 }
 0x698   : > { %1421 = vmatmul.mubr.msk.f32.vlgmr.msra.gmra.mxu1 %vm887_vm13, %v1110_v8 }
 0x758   : > { %v1179_v9 = vpop.f32.mrf.mxu1 }
 0x759   : > { %v1186_v12 = vrot.slane %v1179_v9, 6 }
 0x75a   : > { %v1181_v6 = vpop.f32.mrf.mxu1 }
 0x75b   : > { %v1187_v10 = vrot.slane %v1181_v6, 6  ;;  %v1190_v13 = vadd.f32 %v1186_v12, %v2160_v24 }
 0x75d   : > { %v1191_v3 = vadd.f32 %v1187_v10, %v2156_v61  ;;  %v1422_v1 = vmul.f32 -1.442695, %v1190_v13  ;;  %v1231_v61 = vld [vmem:[%s2258_s7 + $0x30] sm:$0xff] }
 0x75e   : > { %1569 = vmatpush3.msra.mxu0 %v1231_v61 }
 0x75f   : > { %1670 = vtanh.f32 %v1191_v3  ;;  %1570 = vmatprep.subr.mxu0 %v1748_v4  ;;  %v1423_v30 = vmul.f32 -1.442695, %v1191_v3 }
 0x760   : > { %1672 = vpow2.f32 %v1422_v1  ;;  %1571 = vmatpush3.msra.mxu0 %v1230_v19 }
 0x761   : > { %1572 = vmatprep.subr.mxu0 %v1748_v4 }
 0x762   : > { %1573 = vmatpush3.msra.mxu0 %v1229_v20 }
 0x763   : > { %1574 = vmatprep.subr.mxu0 %v1748_v4 }
 0x764   : > { %1575 = vmatpush3.msra.mxu0 %v1228_v21 }
 0x765   : > { %1576 = vmatprep.subr.mxu0 %v1748_v4 }
 0x766   : > { %1577 = vmatpush3.msra.mxu0 %v1227_v22 }
 0x767   : > { %1578 = vmatprep.subr.mxu0 %v1748_v4 }
 0x768   : > { %1579 = vmatpush3.msra.mxu0 %v1226_v27 }
 0x769   : > { %1580 = vmatprep.subr.mxu0 %v1748_v4  ;;  %v1233_v4 = vld [vmem:[%s2259_s8] sm:$0x1] }
 0x76a   : > { %1581 = vmatpush3.msra.mxu0 %v1225_v28 }
 0x76c   : > { %v1671_v11 = vpop.eup %1670 }
 0x76d   : > { %1210 = vrot.lane.b32.xlu0 %v1671_v11, %s1750_s16  ;;  %v1673_v14 = vpop.eup %1672 }
 0x76e   : > { %v1198_v63 = vadd.f32 1.0, %v1673_v14 }
 0x770   : > { %1674 = vrcp.f32 %v1198_v63 }
 0x77d   : > { %v1675_v15 = vpop.eup %1674 }
 0x77e   : > { %v1208_v24 = vmul.f32 %v1675_v15, %v1206_v23 }
 0x7df   : > { %v1211_v16 = vpop.permute.xlu0 %1210 }
 0x7e0   : > { %v1213_v17 = vmul.f32 %v1675_v15, %v1211_v16 }
 0x7e2   : > { %1215 = vrot.lane.b32.xlu1 %v1213_v17, %s1750_s16 }
 0x854   : > { %v1216_v25 = vpop.permute.xlu1 %1215 }
 0x855   : > { %v1218_v26 = vadd.f32 %v1216_v25, %v1208_v24 }
 0x857   : > { %1676 = vtanh.f32 %v1218_v26 }
 0x858   : > { %1678 = vpow2.f32 %v1423_v30 }
 0x864   : > { %v1677_v29 = vpop.eup %1676 }
 0x865   : > { %1221 = vrot.lane.b32.xlu0 %v1677_v29, %s1750_s16  ;;  %v1679_v31 = vpop.eup %1678  ;;  %s323_s16 = sand.u32 1, %s1738_s10  }
 0x866   : > { %v1199_v32 = vadd.f32 1.0, %v1679_v31  ;;  %s324_s14 = scalar_lea.vmem [#allocation2], %s323_s16  ;;  %s1323_s25 = scalar_lea.sflag [#allocation3], %s323_s16 }
 0x867   : > { %s1335_s17 = sshll.u32 %s324_s14, 4  ;;  %s1336_s17 = int_to_ptr.vmem [resolvable:$true] %s1335_s17 }
 0x868   : > { %1680 = vrcp.f32 %v1199_v32  ;;  %s1686_s26 = scalar_lea.vmem %s1336_s17, 16  ;;  %p1693_p0 = scmp.lt.s32.totalorder %s1336_s17, %s1691_s28 }
 0x869   : > { %p1687_p11 = scmp.ne.s32.totalorder %s1336_s17, %s1686_s26  ;;  %p1694_p1 = scmp.lt.s32.totalorder %s1692_s13, %s1686_s26 }
 0x86b   : > { %p1688_p12 = pnand %p1687_p11, %p1840_p5  ;;  %p1695_p2 = por %p1694_p1, %p1693_p0 }
 0x86d   : > { %p1689_p13 = pneg %p1688_p12 }
 0x86f   : > { %p1696_p3 = pnand %p1695_p2, %p1689_p13 }
 0x875   : > { %v1681_v33 = vpop.eup %1680 }
 0x8d7   : > { %v1222_v34 = vpop.permute.xlu0 %1221 }
 0x8d8   : > { %v1224_v35 = vmul.f32 %v1681_v33, %v1222_v34 }
 0x8da   : > { %v1235_v36 = vrot.slane %v1224_v35, 2 }
 0x8dc   : > { %1583 = vmatmul.mubr.msk.f32.vlgmr.msra.gmra.mxu0 %vm887_vm13, %v1235_v36 }
 0x99c   : > { %v1304_v37 = vpop.f32.mrf.mxu0 }
 0x99d   : > { %v1305_v38 = vadd.f32 %v1304_v37, %v1233_v4 }
 0x99e   : > { %v1584_v39 = vpop.f32.mrf.mxu0 }
 0x99f   : > { %v1309_v40 = vsel %vm1308_vm14, %v1305_v38, -inf }
 0x9a0   : > { %1310 = vmax.xlane.f32.xlu1 %v1309_v40 }
 0xa29   : > { %v1311_v41 = vpop.xlane.xlu1 %1310 }
 0xa2a   : > { %v1312_v42 = vsub.f32 %v1305_v38, %v1311_v41 }
 0xa2c   : > { %v1313_v43 = vmul.f32 1.442695, %v1312_v42 }
 0xa2e   : > { %1682 = vpow2.f32 %v1313_v43 }
 0xa3b   : > { %v1683_v44 = vpop.eup %1682 }
 0xa3c   : > { %v1315_v45 = vsel %vm1308_vm14, %v1683_v44, 0.0 }
 0xa3d   : > { %1316 = vadd.xlane.f32.xlu0 %v1315_v45 }
 0xac6   : > { %v1317_v46 = vpop.xlane.xlu0 %1316 }
 0xac7   : > { %1684 = vlog2.f32 %v1317_v46 }
 0xad4   : > { %v1685_v47 = vpop.eup %1684 }
 0xad5   : > { %v1319_v48 = vmul.f32 0.6931472, %v1685_v47 }
 0xad7   : > { %v1320_v49 = vsub.f32 %v1312_v42, %v1319_v48 }
 0xad9   : > { %1321 = vst.msk [vmem:[%s324_s14] sm:$0x1] %vm1308_vm14, %v1320_v49 }
 0xada   : > { %1699 = shalt.err (!%p1696_p3)
}
 0xadb   : > { %s1700_s24 = scalar_lea.hbm %s1333_s22, 16  ;;  %s1704_s14 = scalar_lea.hbm %s2260_s9, 32 }
 0xadc   : > { %p1701_p4 = scmp.ne.s32.totalorder %s1333_s22, %s1700_s24  ;;  %p1705_p9 = scmp.lt.s32.totalorder %s1333_s22, %s2260_s9 }
 0xadd   : > { %p1706_p10 = scmp.lt.s32.totalorder %s1704_s14, %s1700_s24 }
 0xade   : > { %p1702_p7 = pnand %p1701_p4, %p1840_p5 }
 0xadf   : > { %p1707_p11 = por %p1706_p10, %p1705_p9 }
 0xae0   : > { %p1703_p8 = pneg %p1702_p7 }
 0xae2   : > { %p1708_p12 = pnand %p1707_p11, %p1703_p8 }
 0xae4   : > { %1711 = shalt.err (!%p1708_p12)
}
 0xae5   : > { %1586 = dma.vmem_to_hbm [thread:$0]  (%p1840_p5), %s1336_s17, 16, %s1333_s22, %s1323_s25  }
 0xae6 PF: > { %p1592_p13 = scmp.ge.s32.totalorder %s1746_s12, 2  ;;  %s1347_s26 = sand.u32 1, %s1734_s30  }
 0xae7   : > { %s1348_s27 = scalar_lea.sflag [#allocation3], %s1347_s26 }
 0xae8   : > { %p1589_p0 = pnand %p1592_p13, %p1844_p6 }
 0xaea   : > { %p1590_p1 = pneg %p1589_p0 }
 0xaec   : > { %1729 = dma.done.wait (%p1590_p1), %s1348_s27, 16  }
 0xaed   : > { %1731 = vsyncadd (%p1590_p1), %s1348_s27, 4294967280  ;;  %p19_p2 = scmp.ge.s32.totalorder %s1827_s15, 4   ;;  %s2263_s30 = smov %s1738_s10 }
 0xaee   : > { %s2264_s10 = smov %s1742_s11  ;;  %s2265_s11 = smov %s1838_s18 }
 0xaef   : > { %s2266_s12 = smov %s1827_s15  ;;  %21 = sbr.rel (!%p19_p2) target bundleno = 3 (0x3), region = 91 }
 0xaf4   :  { %1352 = vsyncpa [#allocation3], 1 }
 0xaf5   :  { %1354 = vsyncpa [#allocation3 + $0x1], 1 }

</bundles_post_ra>
